<compile_context>
chip_gen: v5e
topology: v5e:2x2
jax: 0.10.0
libtpu: 0.0.40
codegen_flags: <defaults>
</compile_context>

<pallas_src>
import functools
import math

import jax
import jax.numpy as jnp
from jax.experimental import pallas as pl
from jax.experimental.pallas import tpu as pltpu


# ---------------------------------------------------------------------------
# Buffer setup: sinusoidal table, built exactly like PositionalEncoding.__init__.
# ---------------------------------------------------------------------------
def make_positional_table(max_len: int, d_model: int) -> jnp.ndarray:
    position = jnp.arange(0, max_len, dtype=jnp.float32)[:, None]          # (L, 1)
    div_term = jnp.exp(
        jnp.arange(0, d_model, 2, dtype=jnp.float32) * (-math.log(10000.0) / d_model)
    )                                                                       # (D/2,)
    pe = jnp.zeros((max_len, d_model), dtype=jnp.float32)
    pe = pe.at[:, 0::2].set(jnp.sin(position * div_term))
    pe = pe.at[:, 1::2].set(jnp.cos(position * div_term))
    # PyTorch: pe.unsqueeze(0).transpose(0, 1) -> (max_len, 1, d_model)
    return pe[:, None, :]


# ---------------------------------------------------------------------------
# Kernels
# ---------------------------------------------------------------------------
def _pos_enc_kernel_3d(x_ref, pe_ref, o_ref):
    # x (TS, B, D) + pe (TS, 1, D): pe broadcasts over the batch axis.  VPU add.
    o_ref[...] = (x_ref[...] + pe_ref[...]).astype(o_ref.dtype)


def _pos_enc_kernel_2d(x_ref, pe_ref, o_ref, *, batch):
    # Lane-dense layout: x (TS, B*D), pe (TS, D).  Replicate pe across batch
    # along the lane axis (pure lane-dim concat -> XLU slot, off the hot VPU/HBM
    # path), then add.  Column b*D+d pairs with pe[:, d] as required.
    pe = pe_ref[...]
    if batch > 1:
        pe = jnp.concatenate([pe] * batch, axis=-1)       # (TS, B*D)
    o_ref[...] = (x_ref[...] + pe).astype(o_ref.dtype)


# ---------------------------------------------------------------------------
# Tiling heuristic: ~4 MiB x tiles, seq-tile a multiple of 8 (or full extent),
# best-effort even grid-step count for v7x's two TensorCores.
# ---------------------------------------------------------------------------
def _choose_seq_tile(S: int, row_bytes: int,
                     target_bytes: int = 4 * 1024 * 1024) -> int:
    rows = max(8, target_bytes // max(1, row_bytes))
    rows -= rows % 8                       # keep sublane alignment for 2-D layout
    ts = min(S, rows)
    nt = -(-S // ts)
    if nt > 1 and nt % 2 == 1:             # prefer even #steps when already tiled
        ts = -(-S // (nt + 1))
        ts = -(-ts // 8) * 8
    if ts >= S:
        return int(S)
    return int(ts)                         # invariant: ts == S or ts % 8 == 0


# ---------------------------------------------------------------------------
# Wrapper
# ---------------------------------------------------------------------------
def positional_encoding(x: jnp.ndarray, pe_table: jnp.ndarray) -> jnp.ndarray:
    """x: (seq, batch, d_model); pe_table: (max_len, 1, d_model) float32 buffer."""
    S, B, D = x.shape
    max_len = pe_table.shape[0]
    assert max_len >= S, "sequence longer than positional table"

    itemsize = jnp.dtype(x.dtype).itemsize

    # Slice to the S rows actually used BEFORE casting: avoids a full
    # (max_len, D) read+write pass per call when max_len >> S.
    # NOTE: adding in x.dtype (e.g. bf16) differs from torch's f32 promotion by
    # a few ULPs; acceptable for this module.
    pe_rows = pe_table[:S, 0, :].astype(x.dtype)                  # (S, D)

    ts = _choose_seq_tile(S, B * D * itemsize)
    grid = (pl.cdiv(S, ts),)

    cost = pl.CostEstimate(
        flops=S * B * D,
        transcendentals=0,
        bytes_accessed=(2 * S * B * D + S * D) * itemsize,
    )
    cparams = pltpu.CompilerParams(
        dimension_semantics=("parallel",),      # shard seq tiles across TCs (v7x)
        vmem_limit_bytes=32 * 1024 * 1024,      # 2*(4+4) MiB + pe fits everywhere
    )

    # Sublanes pack 8 f32 / 16 bf16 rows: only use the (TS, B, D) layout when it
    # is already lane/sublane dense, otherwise fall back to (S, B*D).
    sublane_pack = (4 // itemsize) * 8 if itemsize <= 4 else 8
    dense_3d = (D % 128 == 0) and (B >= sublane_pack)

    if dense_3d:
        return pl.pallas_call(
            _pos_enc_kernel_3d,
            out_shape=jax.ShapeDtypeStruct((S, B, D), x.dtype),
            grid_spec=pltpu.PrefetchScalarGridSpec(
                num_scalar_prefetch=0,
                grid=grid,
                in_specs=[
                    pl.BlockSpec((ts, B, D), lambda i: (i, 0, 0)),
                    pl.BlockSpec((ts, 1, D), lambda i: (i, 0, 0)),
                ],
                out_specs=pl.BlockSpec((ts, B, D), lambda i: (i, 0, 0)),
            ),
            compiler_params=cparams,
            cost_estimate=cost,
            input_output_aliases={0: 0},        # out aliases x when donated
        )(x, pe_rows[:, None, :])

    # Lane-dense path for small batch / unaligned d_model.
    x2 = x.reshape(S, B * D)                    # free metadata reshape
    out2 = pl.pallas_call(
        functools.partial(_pos_enc_kernel_2d, batch=B),
        out_shape=jax.ShapeDtypeStruct((S, B * D), x.dtype),
        grid_spec=pltpu.PrefetchScalarGridSpec(
            num_scalar_prefetch=0,
            grid=grid,
            in_specs=[
                pl.BlockSpec((ts, B * D), lambda i: (i, 0)),
                pl.BlockSpec((ts, D), lambda i: (i, 0)),
            ],
            out_specs=pl.BlockSpec((ts, B * D), lambda i: (i, 0)),
        ),
        compiler_params=cparams,
        cost_estimate=cost,
        input_output_aliases={0: 0},
    )(x2, pe_rows)
    # dropout p=0.0 -> identity; nothing to apply.
    return out2.reshape(S, B, D)


# ---------------------------------------------------------------------------
# Pure-JAX reference for sanity checking.
# ---------------------------------------------------------------------------
def positional_encoding_ref(x, pe_table):
    S = x.shape[0]
    return x + pe_table[:S, :].astype(x.dtype)  # (S,1,D) broadcasts over batch


if __name__ == "__main__":
    seq_len, batch, d_model, max_len = 8, 2, 32, 64

    key = jax.random.PRNGKey(0)
    x = jax.random.normal(key, (seq_len, batch, d_model), dtype=jnp.float32)

    pe_table = make_positional_table(max_len, d_model)

    # Reference computed first (kernel output may alias a donated x buffer).
    ref = positional_encoding_ref(x, pe_table)

    out = positional_encoding(x, pe_table)
    out = jax.block_until_ready(out)

    assert out.shape == (seq_len, batch, d_model)
    assert jnp.allclose(out, ref, atol=1e-6), "mismatch vs. reference"

    print("KERNEL_OK")
</pallas_src>

<mosaic_0001>
module attributes {stable_mosaic.version = 11 : i64} {
  func.func @_pos_enc_kernel_2d(%arg0: i32, %arg1: memref<8x64xf32, #tpu.memory_space<vmem>>, %arg2: memref<8x32xf32, #tpu.memory_space<vmem>>, %arg3: memref<8x64xf32, #tpu.memory_space<vmem>>) attributes {dimension_semantics = [#tpu.dimension_semantics<parallel>], iteration_bounds = array<i64: 1>, scalar_prefetch = 0 : i64, scratch_operands = 0 : i64, tpu.core_type = #tpu.core_type<tc>, window_params = [{transform_indices = @transform_0, window_bounds = array<i64: 8, 64>}, {transform_indices = @transform_1, window_bounds = array<i64: 8, 32>}, {transform_indices = @transform_2, window_bounds = array<i64: 8, 64>}]} {
    %c0 = arith.constant 0 : index
    %c0_0 = arith.constant 0 : index
    %0 = vector.load %arg2[%c0, %c0_0] : memref<8x32xf32, #tpu.memory_space<vmem>>, vector<8x32xf32>
    %1 = tpu.concatenate %0, %0 in 1 : vector<8x32xf32>, vector<8x32xf32> -> vector<8x64xf32>
    %c0_1 = arith.constant 0 : index
    %c0_2 = arith.constant 0 : index
    %2 = vector.load %arg1[%c0_1, %c0_2] : memref<8x64xf32, #tpu.memory_space<vmem>>, vector<8x64xf32>
    %3 = arith.addf %2, %1 : vector<8x64xf32>
    %c0_3 = arith.constant 0 : index
    %c0_4 = arith.constant 0 : index
    %4 = vector.load %arg3[%c0_3, %c0_4] : memref<8x64xf32, #tpu.memory_space<vmem>>, vector<8x64xf32>
    tpu.vector_store %arg3[%c0_3, %c0_4], %3 {strides = array<i32>} : memref<8x64xf32, #tpu.memory_space<vmem>>, vector<8x64xf32>,
    return
  }
  func.func @transform_0(%arg0: i32) -> (i32, i32) {
    %c0_i32 = arith.constant 0 : i32
    %c0_i32_0 = arith.constant 0 : i32
    return %arg0, %c0_i32 : i32, i32
  }
  func.func @transform_1(%arg0: i32) -> (i32, i32) {
    %c0_i32 = arith.constant 0 : i32
    %c0_i32_0 = arith.constant 0 : i32
    return %arg0, %c0_i32 : i32, i32
  }
  func.func @transform_2(%arg0: i32) -> (i32, i32) {
    %c0_i32 = arith.constant 0 : i32
    %c0_i32_0 = arith.constant 0 : i32
    return %arg0, %c0_i32 : i32, i32
  }
}

</mosaic_0001>

<bundles_post_ra>
// kernel: tpu_custom_call.1
= control target key start
LH: loop header
LB: loop body
LE: loop exit
PB: predicated region body
PF: predicated region fallthrough
CT: control target
= control target key end

     0   :  { %7 = vsyncpa [#allocation3], 0  ;;  %s136_s0 = inlined_call_operand.hbm [shape: f32[8,64], index: 0, kind: input, shape index: {}, may-alias: {0,2}]   ;;  %s137_s1 = inlined_call_operand.vmem [shape: f32[8,32], index: 1, kind: input, shape index: {}]   ;;  %s138_s2 = inlined_call_operand.hbm [shape: f32[8,64], index: 2, kind: output, shape index: {}, may-alias: {0,2}]  }
   0x1   :  { %8 = vsyncpa [#allocation4], 0  ;;  %s14_s11 = sshll.u32 %s136_s0, 4  ;;  %s109_s12 = smov [#allocation2]   ;;  %s15_s11 = int_to_ptr.hbm [resolvable:$true] %s14_s11 }
   0x2   :  { %s16_s13 = sshll.u32 %s109_s12, 4  ;;  %s17_s13 = int_to_ptr.vmem [resolvable:$true] %s16_s13 }
   0x3   :  { %19 = dma.hbm_to_vmem [thread:$0]  %s15_s11, 128, %s17_s13, [#allocation3]  }
   0x4   :  { %105 = dma.done.wait [#allocation3], 128  }
   0x5   :  { %106 = vsyncadd [#allocation3], 4294967168  ;;  %v26_v0 = vld [vmem:[%s137_s1] sm:$0xff]  ;;  %s110_s16 = smov 32   ;;  %vm31_vm0 = vcmask 261120   ;;  %s111_s17 = smov [#allocation5]  }
   0x6   :  { %28 = vrot.lane.b32.xlu0 %v26_v0, %s110_s16  ;;  %v33_v1 = vld [vmem:[#allocation2] sm:$0xff]  ;;  %s42_s18 = sshll.u32 %s111_s17, 4  ;;  %s44_s0 = sshll.u32 %s138_s2, 4  ;;  %vm35_vm1 = vcmask 523264   ;;  %s43_s18 = int_to_ptr.vmem [resolvable:$true] %s42_s18  ;;  %s45_s0 = int_to_ptr.hbm [resolvable:$true] %s44_s0 }
  0x78   :  { %v29_v2 = vpop.permute.xlu0 %28 }
  0x79   :  { %v32_v3 = vsel %vm31_vm0, %v26_v0, %v29_v2 }
  0x7a   :  { %v34_v4 = vadd.f32 %v33_v1, %v32_v3 }
  0x7c   :  { %36 = vst.msk [vmem:[#allocation5] sm:$0xff] %vm35_vm1, %v34_v4 }
  0x7d   :  { %47 = dma.vmem_to_hbm [thread:$0]  %s43_s18, 128, %s45_s0, [#allocation4]  }
  0x7e   :  { %107 = dma.done.wait [#allocation4], 128  }
  0x7f   :  { %108 = vsyncadd [#allocation4], 4294967168 }
  0x80   :  { %52 = vsyncpa [#allocation3], 1 }
  0x81   :  { %53 = vsyncpa [#allocation4], 1 }

</bundles_post_ra>
